<compile_context>
chip_gen: v7x
topology: tpu7x:2x2x1
jax: 0.10.0
libtpu: 0.0.40
codegen_flags: <defaults>
</compile_context>

<pallas_src>
import functools

import jax
import jax.numpy as jnp
from jax.experimental import pallas as pl
from jax.experimental.pallas import tpu as pltpu


def _round_up(n, m):
    return ((n + m - 1) // m) * m


def _softplus(x):
    # numerically stable softplus: max(x,0) + log1p(exp(-|x|))
    return jnp.maximum(x, 0.0) + jnp.log1p(jnp.exp(-jnp.abs(x)))


def dgm_kernel(x_ref, eps_ref,
               w1_ref, b1_ref, w2_ref, b2_ref,
               wh_ref, bh_ref,                       # fused [mu | logvar] head
               wd1_ref, bd1_ref, wd2_ref, bd2_ref,
               recon_ref, mulv_ref, z_ref):
    f32 = jnp.float32
    x = x_ref[...]

    # encoder: Linear -> ReLU -> Linear -> ReLU   (MXU matmuls, f32 accumulate)
    h = jnp.dot(x, w1_ref[...], preferred_element_type=f32) + b1_ref[...]
    h = jnp.maximum(h, 0.0)
    h = jnp.dot(h.astype(w2_ref.dtype), w2_ref[...],
                preferred_element_type=f32) + b2_ref[...]
    h = jnp.maximum(h, 0.0)

    # fused heads: one matmul producing [mu | logvar] side by side (lane-dense)
    mulv = jnp.dot(h.astype(wh_ref.dtype), wh_ref[...],
                   preferred_element_type=f32) + bh_ref[...]
    L = mulv.shape[-1] // 2          # = latent_pad, a multiple of 128
    mu = mulv[:, :L]
    logvar = mulv[:, L:]

    # reparameterize: z = mu + eps * exp(0.5 * logvar)   (EUP exp; f32 VPU math)
    z = mu + eps_ref[...] * jnp.exp(0.5 * logvar)

    # decoder: Linear -> ReLU -> Linear -> Softplus
    d = jnp.dot(z.astype(wd1_ref.dtype), wd1_ref[...],
                preferred_element_type=f32) + bd1_ref[...]
    d = jnp.maximum(d, 0.0)
    logits = jnp.dot(d.astype(wd2_ref.dtype), wd2_ref[...],
                     preferred_element_type=f32) + bd2_ref[...]
    recon = _softplus(logits)

    # lane-dense stores (last dims are multiples of 128)
    recon_ref[...] = recon.astype(recon_ref.dtype)
    mulv_ref[...] = mulv.astype(mulv_ref.dtype)
    z_ref[...] = z.astype(z_ref.dtype)


@functools.partial(jax.jit, static_argnames=("tile_n", "weight_dtype"))
def dgm_forward(x, eps, params, tile_n=256, weight_dtype=jnp.float32):
    """Runs the DGM forward pass. Returns (recon_x, mu, logvar, z).

    weight_dtype=jnp.bfloat16 halves streamed weight/activation bytes on
    v6e/v7x (matmuls still accumulate in f32, elementwise math stays f32).
    """
    N, input_dim = x.shape
    latent_dim = eps.shape[1]
    hidden_dim = params["w1"].shape[1]

    # ---- Pad feature dims to lane-dense multiples of 128 ------------------
    # Zero padding is semantics-preserving: padded input lanes are zero, padded
    # weight rows/cols and biases are zero, so padded activations stay zero (or
    # are garbage only in lanes that get sliced off below).
    Dp = _round_up(max(input_dim, 128), 128)
    Hp = _round_up(max(hidden_dim, 128), 128)
    Lp = _round_up(max(latent_dim, 128), 128)

    # ---- Batch tile --------------------------------------------------------
    # Big tiles amortize the ~0.35us/grid-step pipeline overhead and fill the
    # MXU's M dimension; keep a multiple of 8 (f32 sublanes) and never larger
    # than the (row-padded) batch.
    tile = max(8, _round_up(min(int(tile_n), _round_up(N, 8)), 8))
    Np = _round_up(N, tile)

    wdt = weight_dtype
    f32 = jnp.float32

    def pad2(a, r, c):
        return jnp.pad(a, ((0, r - a.shape[0]), (0, c - a.shape[1])))

    # encoder params (weights optionally bf16; biases stay f32)
    w1 = pad2(params["w1"], Dp, Hp).astype(wdt)
    b1 = pad2(params["b1"], 1, Hp).astype(f32)
    w2 = pad2(params["w2"], Hp, Hp).astype(wdt)
    b2 = pad2(params["b2"], 1, Hp).astype(f32)

    # fused [mu | logvar] head: one (Hp, 2*Lp) matmul instead of two tiny ones
    wh = jnp.zeros((Hp, 2 * Lp), f32)
    wh = wh.at[:hidden_dim, :latent_dim].set(params["wmu"])
    wh = wh.at[:hidden_dim, Lp:Lp + latent_dim].set(params["wlv"])
    wh = wh.astype(wdt)
    bh = jnp.zeros((1, 2 * Lp), f32)
    bh = bh.at[:, :latent_dim].set(params["bmu"].reshape(1, -1))
    bh = bh.at[:, Lp:Lp + latent_dim].set(params["blv"].reshape(1, -1))

    # decoder params
    wd1 = pad2(params["wd1"], Lp, Hp).astype(wdt)
    bd1 = pad2(params["bd1"], 1, Hp).astype(f32)
    wd2 = pad2(params["wd2"], Hp, Dp).astype(wdt)
    bd2 = pad2(params["bd2"], 1, Dp).astype(f32)

    param_list = [w1, b1, w2, b2, wh, bh, wd1, bd1, wd2, bd2]

    # activations / noise, row- and lane-padded
    x_p = jnp.zeros((Np, Dp), f32).at[:N, :input_dim].set(x.astype(f32)).astype(wdt)
    eps_p = jnp.zeros((Np, Lp), f32).at[:N, :latent_dim].set(eps.astype(f32))

    # ---- Specs -------------------------------------------------------------
    def batch_spec(cols):
        return pl.BlockSpec((tile, cols), lambda i: (i, 0))

    def full_spec(a):
        return pl.BlockSpec(a.shape, lambda i: (0, 0))

    in_specs = [batch_spec(Dp), batch_spec(Lp)] + [full_spec(p) for p in param_list]
    out_specs = [batch_spec(Dp),        # recon_x (padded)
                 batch_spec(2 * Lp),    # [mu | logvar] slab
                 batch_spec(Lp)]        # z (padded)
    out_shape = (jax.ShapeDtypeStruct((Np, Dp), f32),
                 jax.ShapeDtypeStruct((Np, 2 * Lp), f32),
                 jax.ShapeDtypeStruct((Np, Lp), f32))

    # ---- VMEM budget & cost estimate ---------------------------------------
    param_bytes = sum(p.size * p.dtype.itemsize for p in param_list)
    # whole-weight specs are double-buffered even with a constant index_map;
    # batch-tiled streams are double-buffered too.
    tile_bytes = 4 * tile * (Dp + Lp) + 4 * tile * (Dp + 3 * Lp)
    budget = 2 * param_bytes + 2 * tile_bytes + (4 << 20)
    vmem_limit = int(min(max(budget, 32 << 20), 64 << 20))
    # TODO(synk): for realistic gene counts (input_dim >= ~8K) on v7x (64 MiB
    # VMEM), cast weights to bf16 and/or add a reduction grid axis over
    # input_dim for the w1/wd2 matmuls instead of keeping them whole-resident.

    flops = 2 * Np * (Dp * Hp + Hp * Hp + Hp * 2 * Lp + Lp * Hp + Hp * Dp)
    transcendentals = Np * (Lp + 2 * Dp)          # reparam exp + softplus exp/log1p
    bytes_accessed = int(x_p.size * x_p.dtype.itemsize
                         + eps_p.size * 4
                         + param_bytes
                         + Np * (Dp + 3 * Lp) * 4)
    cost = pl.CostEstimate(flops=int(flops),
                           transcendentals=int(transcendentals),
                           bytes_accessed=bytes_accessed)

    recon_p, mulv_p, z_p = pl.pallas_call(
        dgm_kernel,
        out_shape=out_shape,
        grid_spec=pltpu.PrefetchScalarGridSpec(
            num_scalar_prefetch=0,
            grid=(Np // tile,),
            in_specs=in_specs,
            out_specs=out_specs,
        ),
        compiler_params=pltpu.CompilerParams(
            dimension_semantics=("parallel",),     # shards batch across TCs on v7x
            vmem_limit_bytes=vmem_limit),
        cost_estimate=cost,
    )(x_p, eps_p, *param_list)

    # slice away row/lane padding
    recon = recon_p[:N, :input_dim]
    mu = mulv_p[:N, :latent_dim]
    logvar = mulv_p[:N, Lp:Lp + latent_dim]
    z = z_p[:N, :latent_dim]
    return recon, mu, logvar, z


def init_params(key, input_dim, hidden_dim, latent_dim):
    """Deterministic synthetic parameters (PyTorch-like uniform fan-in init)."""
    def linear(key, fan_in, fan_out):
        k_w, k_b = jax.random.split(key)
        bound = 1.0 / jnp.sqrt(fan_in)
        w = jax.random.uniform(k_w, (fan_in, fan_out), jnp.float32, -bound, bound)
        b = jax.random.uniform(k_b, (1, fan_out), jnp.float32, -bound, bound)
        return w, b

    keys = jax.random.split(key, 6)
    w1, b1 = linear(keys[0], input_dim, hidden_dim)
    w2, b2 = linear(keys[1], hidden_dim, hidden_dim)
    wmu, bmu = linear(keys[2], hidden_dim, latent_dim)
    wlv, blv = linear(keys[3], hidden_dim, latent_dim)
    wd1, bd1 = linear(keys[4], latent_dim, hidden_dim)
    wd2, bd2 = linear(keys[5], hidden_dim, input_dim)
    return dict(w1=w1, b1=b1, w2=w2, b2=b2, wmu=wmu, bmu=bmu, wlv=wlv, blv=blv,
                wd1=wd1, bd1=bd1, wd2=wd2, bd2=bd2)


def dgm_forward_ref(x, eps, p):
    """Pure-JAX reference for validation."""
    h = jnp.maximum(x @ p["w1"] + p["b1"], 0.0)
    h = jnp.maximum(h @ p["w2"] + p["b2"], 0.0)
    mu = h @ p["wmu"] + p["bmu"]
    logvar = h @ p["wlv"] + p["blv"]
    z = mu + eps * jnp.exp(0.5 * logvar)
    d = jnp.maximum(z @ p["wd1"] + p["bd1"], 0.0)
    recon = jax.nn.softplus(d @ p["wd2"] + p["bd2"])
    return recon, mu, logvar, z


if __name__ == "__main__":
    # small shapes consistent with the module's forward
    # (N deliberately not a multiple of 8 to exercise batch-row padding)
    N, input_dim, hidden_dim, latent_dim = 20, 48, 32, 8

    key = jax.random.PRNGKey(0)
    k_x, k_eps, k_p = jax.random.split(key, 3)

    x = jax.random.uniform(k_x, (N, input_dim), jnp.float32)      # expression counts-ish
    eps = jax.random.normal(k_eps, (N, latent_dim), jnp.float32)  # reparam noise
    params = init_params(k_p, input_dim, hidden_dim, latent_dim)

    recon, mu, logvar, z = dgm_forward(x, eps, params)
    jax.block_until_ready((recon, mu, logvar, z))

    # sanity check against pure-JAX reference
    recon_r, mu_r, logvar_r, z_r = dgm_forward_ref(x, eps, params)
    for a, b in ((recon, recon_r), (mu, mu_r), (logvar, logvar_r), (z, z_r)):
        assert a.shape == b.shape, "shape mismatch vs reference"
        assert jnp.allclose(a, b, atol=1e-5, rtol=1e-5), "mismatch vs reference"

    print("KERNEL_OK")
</pallas_src>

<mosaic_0001>
module attributes {stable_mosaic.version = 11 : i64} {
  func.func @dgm_kernel(%arg0: i32, %arg1: memref<24x128xf32, #tpu.memory_space<vmem>>, %arg2: memref<24x128xf32, #tpu.memory_space<vmem>>, %arg3: memref<128x128xf32, #tpu.memory_space<vmem>>, %arg4: memref<1x128xf32, #tpu.memory_space<vmem>>, %arg5: memref<128x128xf32, #tpu.memory_space<vmem>>, %arg6: memref<1x128xf32, #tpu.memory_space<vmem>>, %arg7: memref<128x256xf32, #tpu.memory_space<vmem>>, %arg8: memref<1x256xf32, #tpu.memory_space<vmem>>, %arg9: memref<128x128xf32, #tpu.memory_space<vmem>>, %arg10: memref<1x128xf32, #tpu.memory_space<vmem>>, %arg11: memref<128x128xf32, #tpu.memory_space<vmem>>, %arg12: memref<1x128xf32, #tpu.memory_space<vmem>>, %arg13: memref<24x128xf32, #tpu.memory_space<vmem>>, %arg14: memref<24x256xf32, #tpu.memory_space<vmem>>, %arg15: memref<24x128xf32, #tpu.memory_space<vmem>>) attributes {dimension_semantics = [#tpu.dimension_semantics<parallel>], iteration_bounds = array<i64: 1>, scalar_prefetch = 0 : i64, scratch_operands = 0 : i64, tpu.core_type = #tpu.core_type<tc>, window_params = [{transform_indices = @transform_0, window_bounds = array<i64: 24, 128>}, {transform_indices = @transform_1, window_bounds = array<i64: 24, 128>}, {pipeline_mode = #tpu.pipeline_mode<synchronous>, transform_indices = @transform_2, window_bounds = array<i64: 128, 128>}, {pipeline_mode = #tpu.pipeline_mode<synchronous>, transform_indices = @transform_3, window_bounds = array<i64: 1, 128>}, {pipeline_mode = #tpu.pipeline_mode<synchronous>, transform_indices = @transform_4, window_bounds = array<i64: 128, 128>}, {pipeline_mode = #tpu.pipeline_mode<synchronous>, transform_indices = @transform_5, window_bounds = array<i64: 1, 128>}, {pipeline_mode = #tpu.pipeline_mode<synchronous>, transform_indices = @transform_6, window_bounds = array<i64: 128, 256>}, {pipeline_mode = #tpu.pipeline_mode<synchronous>, transform_indices = @transform_7, window_bounds = array<i64: 1, 256>}, {pipeline_mode = #tpu.pipeline_mode<synchronous>, transform_indices = @transform_8, window_bounds = array<i64: 128, 128>}, {pipeline_mode = #tpu.pipeline_mode<synchronous>, transform_indices = @transform_9, window_bounds = array<i64: 1, 128>}, {pipeline_mode = #tpu.pipeline_mode<synchronous>, transform_indices = @transform_10, window_bounds = array<i64: 128, 128>}, {pipeline_mode = #tpu.pipeline_mode<synchronous>, transform_indices = @transform_11, window_bounds = array<i64: 1, 128>}, {transform_indices = @transform_12, window_bounds = array<i64: 24, 128>}, {transform_indices = @transform_13, window_bounds = array<i64: 24, 256>}, {transform_indices = @transform_14, window_bounds = array<i64: 24, 128>}]} {
    %c0 = arith.constant 0 : index
    %c0_0 = arith.constant 0 : index
    %0 = vector.load %arg1[%c0, %c0_0] : memref<24x128xf32, #tpu.memory_space<vmem>>, vector<24x128xf32>
    %c0_1 = arith.constant 0 : index
    %c0_2 = arith.constant 0 : index
    %1 = vector.load %arg3[%c0_1, %c0_2] : memref<128x128xf32, #tpu.memory_space<vmem>>, vector<128x128xf32>
    %cst = arith.constant dense<0.000000e+00> : vector<24x128xf32>
    %2 = tpu.matmul %0, %1, %cst {dimension_numbers = #tpu.dot_dimension_numbers<[1], [0], [0], [1], [0, 0, 1, 1], [], []>} : vector<24x128xf32>, vector<128x128xf32>, vector<24x128xf32> -> vector<24x128xf32>
    %c0_3 = arith.constant 0 : index
    %c0_4 = arith.constant 0 : index
    %3 = vector.load %arg4[%c0_3, %c0_4] : memref<1x128xf32, #tpu.memory_space<vmem>>, vector<1x128xf32>
    %4 = vector.broadcast %3 : vector<1x128xf32> to vector<24x128xf32>
    %5 = arith.addf %2, %4 : vector<24x128xf32>
    %cst_5 = arith.constant 0.000000e+00 : f32
    %6 = vector.broadcast %cst_5 : f32 to vector<24x128xf32>
    %7 = arith.maximumf %5, %6 : vector<24x128xf32>
    %c0_6 = arith.constant 0 : index
    %c0_7 = arith.constant 0 : index
    %8 = vector.load %arg5[%c0_6, %c0_7] : memref<128x128xf32, #tpu.memory_space<vmem>>, vector<128x128xf32>
    %cst_8 = arith.constant dense<0.000000e+00> : vector<24x128xf32>
    %9 = tpu.matmul %7, %8, %cst_8 {dimension_numbers = #tpu.dot_dimension_numbers<[1], [0], [0], [1], [0, 0, 1, 1], [], []>} : vector<24x128xf32>, vector<128x128xf32>, vector<24x128xf32> -> vector<24x128xf32>
    %c0_9 = arith.constant 0 : index
    %c0_10 = arith.constant 0 : index
    %10 = vector.load %arg6[%c0_9, %c0_10] : memref<1x128xf32, #tpu.memory_space<vmem>>, vector<1x128xf32>
    %11 = vector.broadcast %10 : vector<1x128xf32> to vector<24x128xf32>
    %12 = arith.addf %9, %11 : vector<24x128xf32>
    %cst_11 = arith.constant 0.000000e+00 : f32
    %13 = vector.broadcast %cst_11 : f32 to vector<24x128xf32>
    %14 = arith.maximumf %12, %13 : vector<24x128xf32>
    %c0_12 = arith.constant 0 : index
    %c0_13 = arith.constant 0 : index
    %15 = vector.load %arg7[%c0_12, %c0_13] : memref<128x256xf32, #tpu.memory_space<vmem>>, vector<128x256xf32>
    %cst_14 = arith.constant dense<0.000000e+00> : vector<24x256xf32>
    %16 = tpu.matmul %14, %15, %cst_14 {dimension_numbers = #tpu.dot_dimension_numbers<[1], [0], [0], [1], [0, 0, 1, 1], [], []>} : vector<24x128xf32>, vector<128x256xf32>, vector<24x256xf32> -> vector<24x256xf32>
    %c0_15 = arith.constant 0 : index
    %c0_16 = arith.constant 0 : index
    %17 = vector.load %arg8[%c0_15, %c0_16] : memref<1x256xf32, #tpu.memory_space<vmem>>, vector<1x256xf32>
    %18 = vector.broadcast %17 : vector<1x256xf32> to vector<24x256xf32>
    %19 = arith.addf %16, %18 : vector<24x256xf32>
    %20 = vector.extract_strided_slice %19 {offsets = [0, 0], sizes = [24, 128], strides = [1, 1]} : vector<24x256xf32> to vector<24x128xf32>
    %21 = vector.extract_strided_slice %19 {offsets = [0, 128], sizes = [24, 128], strides = [1, 1]} : vector<24x256xf32> to vector<24x128xf32>
    %c0_17 = arith.constant 0 : index
    %c0_18 = arith.constant 0 : index
    %22 = vector.load %arg2[%c0_17, %c0_18] : memref<24x128xf32, #tpu.memory_space<vmem>>, vector<24x128xf32>
    %cst_19 = arith.constant 5.000000e-01 : f32
    %23 = vector.broadcast %cst_19 : f32 to vector<24x128xf32>
    %24 = arith.mulf %23, %21 : vector<24x128xf32>
    %25 = math.exp %24 : vector<24x128xf32>
    %26 = arith.mulf %22, %25 : vector<24x128xf32>
    %27 = arith.addf %20, %26 : vector<24x128xf32>
    %c0_20 = arith.constant 0 : index
    %c0_21 = arith.constant 0 : index
    %28 = vector.load %arg9[%c0_20, %c0_21] : memref<128x128xf32, #tpu.memory_space<vmem>>, vector<128x128xf32>
    %cst_22 = arith.constant dense<0.000000e+00> : vector<24x128xf32>
    %29 = tpu.matmul %27, %28, %cst_22 {dimension_numbers = #tpu.dot_dimension_numbers<[1], [0], [0], [1], [0, 0, 1, 1], [], []>} : vector<24x128xf32>, vector<128x128xf32>, vector<24x128xf32> -> vector<24x128xf32>
    %c0_23 = arith.constant 0 : index
    %c0_24 = arith.constant 0 : index
    %30 = vector.load %arg10[%c0_23, %c0_24] : memref<1x128xf32, #tpu.memory_space<vmem>>, vector<1x128xf32>
    %31 = vector.broadcast %30 : vector<1x128xf32> to vector<24x128xf32>
    %32 = arith.addf %29, %31 : vector<24x128xf32>
    %cst_25 = arith.constant 0.000000e+00 : f32
    %33 = vector.broadcast %cst_25 : f32 to vector<24x128xf32>
    %34 = arith.maximumf %32, %33 : vector<24x128xf32>
    %c0_26 = arith.constant 0 : index
    %c0_27 = arith.constant 0 : index
    %35 = vector.load %arg11[%c0_26, %c0_27] : memref<128x128xf32, #tpu.memory_space<vmem>>, vector<128x128xf32>
    %cst_28 = arith.constant dense<0.000000e+00> : vector<24x128xf32>
    %36 = tpu.matmul %34, %35, %cst_28 {dimension_numbers = #tpu.dot_dimension_numbers<[1], [0], [0], [1], [0, 0, 1, 1], [], []>} : vector<24x128xf32>, vector<128x128xf32>, vector<24x128xf32> -> vector<24x128xf32>
    %c0_29 = arith.constant 0 : index
    %c0_30 = arith.constant 0 : index
    %37 = vector.load %arg12[%c0_29, %c0_30] : memref<1x128xf32, #tpu.memory_space<vmem>>, vector<1x128xf32>
    %38 = vector.broadcast %37 : vector<1x128xf32> to vector<24x128xf32>
    %39 = arith.addf %36, %38 : vector<24x128xf32>
    %cst_31 = arith.constant 0.000000e+00 : f32
    %40 = vector.broadcast %cst_31 : f32 to vector<24x128xf32>
    %41 = arith.maximumf %39, %40 : vector<24x128xf32>
    %42 = math.absf %39 : vector<24x128xf32>
    %cst_32 = arith.constant 0.000000e+00 : f32
    %43 = vector.broadcast %cst_32 : f32 to vector<24x128xf32>
    %44 = arith.subf %43, %42 : vector<24x128xf32>
    %45 = math.exp %44 : vector<24x128xf32>
    %46 = math.log1p %45 : vector<24x128xf32>
    %47 = arith.addf %41, %46 : vector<24x128xf32>
    %c0_33 = arith.constant 0 : index
    %c0_34 = arith.constant 0 : index
    %48 = vector.load %arg13[%c0_33, %c0_34] : memref<24x128xf32, #tpu.memory_space<vmem>>, vector<24x128xf32>
    tpu.vector_store %arg13[%c0_33, %c0_34], %47 {strides = array<i32>} : memref<24x128xf32, #tpu.memory_space<vmem>>, vector<24x128xf32>,
    %c0_35 = arith.constant 0 : index
    %c0_36 = arith.constant 0 : index
    %49 = vector.load %arg14[%c0_35, %c0_36] : memref<24x256xf32, #tpu.memory_space<vmem>>, vector<24x256xf32>
    tpu.vector_store %arg14[%c0_35, %c0_36], %19 {strides = array<i32>} : memref<24x256xf32, #tpu.memory_space<vmem>>, vector<24x256xf32>,
    %c0_37 = arith.constant 0 : index
    %c0_38 = arith.constant 0 : index
    %50 = vector.load %arg15[%c0_37, %c0_38] : memref<24x128xf32, #tpu.memory_space<vmem>>, vector<24x128xf32>
    tpu.vector_store %arg15[%c0_37, %c0_38], %27 {strides = array<i32>} : memref<24x128xf32, #tpu.memory_space<vmem>>, vector<24x128xf32>,
    return
  }
  func.func @transform_0(%arg0: i32) -> (i32, i32) {
    %c0_i32 = arith.constant 0 : i32
    %c0_i32_0 = arith.constant 0 : i32
    return %arg0, %c0_i32 : i32, i32
  }
  func.func @transform_1(%arg0: i32) -> (i32, i32) {
    %c0_i32 = arith.constant 0 : i32
    %c0_i32_0 = arith.constant 0 : i32
    return %arg0, %c0_i32 : i32, i32
  }
  func.func @transform_2(%arg0: i32) -> (i32, i32) {
    %c0_i32 = arith.constant 0 : i32
    %c0_i32_0 = arith.constant 0 : i32
    %c0_i32_1 = arith.constant 0 : i32
    return %c0_i32, %c0_i32_0 : i32, i32
  }
  func.func @transform_3(%arg0: i32) -> (i32, i32) {
    %c0_i32 = arith.constant 0 : i32
    %c0_i32_0 = arith.constant 0 : i32
    %c0_i32_1 = arith.constant 0 : i32
    return %c0_i32, %c0_i32_0 : i32, i32
  }
  func.func @transform_4(%arg0: i32) -> (i32, i32) {
    %c0_i32 = arith.constant 0 : i32
    %c0_i32_0 = arith.constant 0 : i32
    %c0_i32_1 = arith.constant 0 : i32
    return %c0_i32, %c0_i32_0 : i32, i32
  }
  func.func @transform_5(%arg0: i32) -> (i32, i32) {
    %c0_i32 = arith.constant 0 : i32
    %c0_i32_0 = arith.constant 0 : i32
    %c0_i32_1 = arith.constant 0 : i32
    return %c0_i32, %c0_i32_0 : i32, i32
  }
  func.func @transform_6(%arg0: i32) -> (i32, i32) {
    %c0_i32 = arith.constant 0 : i32
    %c0_i32_0 = arith.constant 0 : i32
    %c0_i32_1 = arith.constant 0 : i32
    return %c0_i32, %c0_i32_0 : i32, i32
  }
  func.func @transform_7(%arg0: i32) -> (i32, i32) {
    %c0_i32 = arith.constant 0 : i32
    %c0_i32_0 = arith.constant 0 : i32
    %c0_i32_1 = arith.constant 0 : i32
    return %c0_i32, %c0_i32_0 : i32, i32
  }
  func.func @transform_8(%arg0: i32) -> (i32, i32) {
    %c0_i32 = arith.constant 0 : i32
    %c0_i32_0 = arith.constant 0 : i32
    %c0_i32_1 = arith.constant 0 : i32
    return %c0_i32, %c0_i32_0 : i32, i32
  }
  func.func @transform_9(%arg0: i32) -> (i32, i32) {
    %c0_i32 = arith.constant 0 : i32
    %c0_i32_0 = arith.constant 0 : i32
    %c0_i32_1 = arith.constant 0 : i32
    return %c0_i32, %c0_i32_0 : i32, i32
  }
  func.func @transform_10(%arg0: i32) -> (i32, i32) {
    %c0_i32 = arith.constant 0 : i32
    %c0_i32_0 = arith.constant 0 : i32
    %c0_i32_1 = arith.constant 0 : i32
    return %c0_i32, %c0_i32_0 : i32, i32
  }
  func.func @transform_11(%arg0: i32) -> (i32, i32) {
    %c0_i32 = arith.constant 0 : i32
    %c0_i32_0 = arith.constant 0 : i32
    %c0_i32_1 = arith.constant 0 : i32
    return %c0_i32, %c0_i32_0 : i32, i32
  }
  func.func @transform_12(%arg0: i32) -> (i32, i32) {
    %c0_i32 = arith.constant 0 : i32
    %c0_i32_0 = arith.constant 0 : i32
    return %arg0, %c0_i32 : i32, i32
  }
  func.func @transform_13(%arg0: i32) -> (i32, i32) {
    %c0_i32 = arith.constant 0 : i32
    %c0_i32_0 = arith.constant 0 : i32
    return %arg0, %c0_i32 : i32, i32
  }
  func.func @transform_14(%arg0: i32) -> (i32, i32) {
    %c0_i32 = arith.constant 0 : i32
    %c0_i32_0 = arith.constant 0 : i32
    return %arg0, %c0_i32 : i32, i32
  }
}

</mosaic_0001>

<bundles_post_ra>
// kernel: dgm_forward.1
= control target key start
LH: loop header
LB: loop body
LE: loop exit
PB: predicated region body
PF: predicated region fallthrough
CT: control target
= control target key end

     0   :  { %v1131_v3 = vmov 0.0|0.0   ;;  %vm1132_vm0 = vmmov 0   ;;  %v1133_v6 = vmov 0.0   ;;  %s1667_s0 = inlined_call_operand.vmem [shape: f32[24,128], index: 0, kind: input, shape index: {}]   ;;  %s1668_s1 = inlined_call_operand.vmem [shape: f32[24,128], index: 1, kind: input, shape index: {}]   ;;  %s1669_s2 = inlined_call_operand.vmem [shape: f32[128,128], index: 2, kind: input, shape index: {}]   ;;  %s1670_s3 = inlined_call_operand.vmem [shape: f32[1,128], index: 3, kind: input, shape index: {}]   ;;  %s1671_s4 = inlined_call_operand.vmem [shape: f32[128,128], index: 4, kind: input, shape index: {}]   ;;  %s1672_s5 = inlined_call_operand.vmem [shape: f32[1,128], index: 5, kind: input, shape index: {}]   ;;  %s1673_s6 = inlined_call_operand.vmem [shape: f32[128,256], index: 6, kind: input, shape index: {}]   ;;  %s1674_s7 = inlined_call_operand.vmem [shape: f32[1,256], index: 7, kind: input, shape index: {}]   ;;  %s1675_s8 = inlined_call_operand.vmem [shape: f32[128,128], index: 8, kind: input, shape index: {}]   ;;  %s1676_s9 = inlined_call_operand.vmem [shape: f32[1,128], index: 9, kind: input, shape index: {}]   ;;  %s1677_s10 = inlined_call_operand.vmem [shape: f32[128,128], index: 10, kind: input, shape index: {}]   ;;  %s1678_s11 = inlined_call_operand.vmem [shape: f32[1,128], index: 11, kind: input, shape index: {}]   ;;  %s1679_s12 = inlined_call_operand.hbm [shape: f32[24,128], index: 12, kind: output, shape index: {0}]   ;;  %s1680_s13 = inlined_call_operand.vmem [shape: f32[24,256], index: 13, kind: output, shape index: {1}]   ;;  %s1681_s14 = inlined_call_operand.vmem [shape: f32[24,128], index: 14, kind: output, shape index: {2}]  }
   0x1   :  { %v48_v0 = vld [vmem:[%s1669_s2] sm:$0xff]  ;;  %v49_v1 = vld [vmem:[%s1669_s2 + $0x8] sm:$0xff]  ;;  %v50_v2 = vld [vmem:[%s1669_s2 + $0x10] sm:$0xff]  ;;  %939 = vmatprep.subr.bf16.mxu0 %v1131_v3  ;;  %807 = vmatprep.mubr.msk.f32.mxu0 %vm1132_vm0, %v1133_v6 }
   0x2   :  { %v940_v4 = vpack.c.bf16 %v49_v1, %v48_v0  ;;  %v51_v5 = vld [vmem:[%s1669_s2 + $0x18] sm:$0xff]  ;;  %963 = vmatprep.subr.bf16.mxu1 %v1131_v3  ;;  %848 = vmatprep.mubr.msk.f32.mxu1 %vm1132_vm0, %v1133_v6  ;;  %v52_v8 = vld [vmem:[%s1669_s2 + $0x20] sm:$0xff]  ;;  %v53_v9 = vld [vmem:[%s1669_s2 + $0x28] sm:$0xff] }
   0x3   :  { %v943_v7 = vpack.c.bf16 %v51_v5, %v50_v2  ;;  %v154_v10 = vld [vmem:[%s1671_s4] sm:$0xff]  ;;  %v155_v11 = vld [vmem:[%s1671_s4 + $0x8] sm:$0xff]  ;;  %v946_v12 = vpack.c.bf16 %v53_v9, %v52_v8  ;;  %v156_v14 = vld [vmem:[%s1671_s4 + $0x10] sm:$0xff] }
   0x4   :  { %941 = vmatpush3.bf16.msra.mxu0 %v940_v4  ;;  %v964_v13 = vpack.c.bf16 %v155_v11, %v154_v10  ;;  %v157_v15 = vld [vmem:[%s1671_s4 + $0x18] sm:$0xff]  ;;  %v54_v16 = vld [vmem:[%s1669_s2 + $0x30] sm:$0xff]  ;;  %v158_v19 = vld [vmem:[%s1671_s4 + $0x20] sm:$0xff] }
   0x5   :  { %942 = vmatprep.subr.bf16.mxu0 %v1131_v3  ;;  %v55_v17 = vld [vmem:[%s1669_s2 + $0x38] sm:$0xff]  ;;  %v967_v18 = vpack.c.bf16 %v157_v15, %v156_v14  ;;  %v159_v20 = vld [vmem:[%s1671_s4 + $0x28] sm:$0xff] }
   0x6   :  { %965 = vmatpush3.bf16.msra.mxu1 %v964_v13  ;;  %v949_v21 = vpack.c.bf16 %v55_v17, %v54_v16 }
   0x7   :  { %966 = vmatprep.subr.bf16.mxu1 %v1131_v3 }
   0x8   :  { %944 = vmatpush3.bf16.msra.mxu0 %v943_v7 }
   0x9   :  { %945 = vmatprep.subr.bf16.mxu0 %v1131_v3 }
   0xc   :  { %947 = vmatpush3.bf16.msra.mxu0 %v946_v12 }
   0xd   :  { %20 = vsyncpa [#allocation3], 0  ;;  %948 = vmatprep.subr.bf16.mxu0 %v1131_v3  ;;  %v56_v22 = vld [vmem:[%s1669_s2 + $0x40] sm:$0xff]  ;;  %v57_v23 = vld [vmem:[%s1669_s2 + $0x48] sm:$0xff]  ;;  %968 = vmatpush3.bf16.msra.mxu1 %v967_v18  ;;  %v970_v24 = vpack.c.bf16 %v159_v20, %v158_v19 }
   0xe   :  { %969 = vmatprep.subr.bf16.mxu1 %v1131_v3  ;;  %v160_v25 = vld [vmem:[%s1671_s4 + $0x30] sm:$0xff]  ;;  %v161_v26 = vld [vmem:[%s1671_s4 + $0x38] sm:$0xff]  ;;  %v952_v27 = vpack.c.bf16 %v57_v23, %v56_v22  ;;  %v162_v31 = vld [vmem:[%s1671_s4 + $0x40] sm:$0xff] }
   0xf   :  { %v58_v28 = vld [vmem:[%s1669_s2 + $0x50] sm:$0xff]  ;;  %v59_v29 = vld [vmem:[%s1669_s2 + $0x58] sm:$0xff]  ;;  %v973_v30 = vpack.c.bf16 %v161_v26, %v160_v25  ;;  %v163_v32 = vld [vmem:[%s1671_s4 + $0x48] sm:$0xff] }
  0x10   :  { %950 = vmatpush3.bf16.msra.mxu0 %v949_v21  ;;  %v955_v33 = vpack.c.bf16 %v59_v29, %v58_v28  ;;  %v60_v34 = vld [vmem:[%s1669_s2 + $0x60] sm:$0xff]  ;;  %v61_v35 = vld [vmem:[%s1669_s2 + $0x68] sm:$0xff]  ;;  %v976_v36 = vpack.c.bf16 %v163_v32, %v162_v31  ;;  %v164_v37 = vld [vmem:[%s1671_s4 + $0x50] sm:$0xff] }
  0x11   :  { %951 = vmatprep.subr.bf16.mxu0 %v1131_v3  ;;  %971 = vmatpush3.bf16.msra.mxu1 %v970_v24  ;;  %v165_v38 = vld [vmem:[%s1671_s4 + $0x58] sm:$0xff]  ;;  %v958_v39 = vpack.c.bf16 %v61_v35, %v60_v34  ;;  %v62_v40 = vld [vmem:[%s1669_s2 + $0x70] sm:$0xff]  ;;  %v166_v43 = vld [vmem:[%s1671_s4 + $0x60] sm:$0xff] }
  0x12   :  { %972 = vmatprep.subr.bf16.mxu1 %v1131_v3  ;;  %v63_v41 = vld [vmem:[%s1669_s2 + $0x78] sm:$0xff]  ;;  %v979_v42 = vpack.c.bf16 %v165_v38, %v164_v37  ;;  %v167_v44 = vld [vmem:[%s1671_s4 + $0x68] sm:$0xff]  ;;  %v45_v47 = vld [vmem:[%s1667_s0] sm:$0xff] }
  0x13   :  { %v961_v45 = vpack.c.bf16 %v63_v41, %v62_v40  ;;  %v982_v46 = vpack.c.bf16 %v167_v44, %v166_v43  ;;  %v46_v48 = vld [vmem:[%s1667_s0 + $0x8] sm:$0xff]  ;;  %v47_v49 = vld [vmem:[%s1667_s0 + $0x10] sm:$0xff]  ;;  %v169_v51 = vld [vmem:[%s1671_s4 + $0x78] sm:$0xff] }
  0x14   :  { %953 = vmatpush3.bf16.msra.mxu0 %v952_v27  ;;  %v168_v50 = vld [vmem:[%s1671_s4 + $0x70] sm:$0xff]  ;;  %v261_v53 = vld [vmem:[%s1673_s6 + $0x8] sm:$0xff]  ;;  %v263_v54 = vld [vmem:[%s1673_s6 + $0x18] sm:$0xff] }
  0x15   :  { %954 = vmatprep.subr.bf16.mxu0 %v1131_v3  ;;  %974 = vmatpush3.bf16.msra.mxu1 %v973_v30  ;;  %v985_v52 = vpack.c.bf16 %v169_v51, %v168_v50  ;;  %v260_v55 = vld [vmem:[%s1673_s6] sm:$0xff]  ;;  %v987_v56 = vpack.c.bf16 %v263_v54, %v261_v53  ;;  %v262_v57 = vld [vmem:[%s1673_s6 + $0x10] sm:$0xff]  ;;  %v265_v58 = vld [vmem:[%s1673_s6 + $0x28] sm:$0xff] }
  0x16   :  { %975 = vmatprep.subr.bf16.mxu1 %v1131_v3  ;;  %v267_v59 = vld [vmem:[%s1673_s6 + $0x38] sm:$0xff]  ;;  %v989_v60 = vpack.c.bf16 %v262_v57, %v260_v55  ;;  %v264_v62 = vld [vmem:[%s1673_s6 + $0x20] sm:$0xff]  ;;  %v266_v63 = vld [vmem:[%s1673_s6 + $0x30] sm:$0xff] }
  0x17   :  { %v991_v61 = vpack.c.bf16 %v267_v59, %v265_v58  ;;  %v269_v0 = vld [vmem:[%s1673_s6 + $0x48] sm:$0xff]  ;;  %v271_v1 = vld [vmem:[%s1673_s6 + $0x58] sm:$0xff]  ;;  %v993_v2 = vpack.c.bf16 %v266_v63, %v264_v62  ;;  %v268_v5 = vld [vmem:[%s1673_s6 + $0x40] sm:$0xff] }
  0x18   :  { %956 = vmatpush3.bf16.msra.mxu0 %v955_v33  ;;  %v995_v4 = vpack.c.bf16 %v271_v1, %v269_v0  ;;  %v270_v7 = vld [vmem:[%s1673_s6 + $0x50] sm:$0xff]  ;;  %v273_v8 = vld [vmem:[%s1673_s6 + $0x68] sm:$0xff]  ;;  %v275_v9 = vld [vmem:[%s1673_s6 + $0x78] sm:$0xff] }
  0x19   :  { %957 = vmatprep.subr.bf16.mxu0 %v1131_v3  ;;  %977 = vmatpush3.bf16.msra.mxu1 %v976_v36  ;;  %v997_v10 = vpack.c.bf16 %v270_v7, %v268_v5  ;;  %v999_v11 = vpack.c.bf16 %v275_v9, %v273_v8  ;;  %v272_v12 = vld [vmem:[%s1673_s6 + $0x60] sm:$0xff]  ;;  %v274_v13 = vld [vmem:[%s1673_s6 + $0x70] sm:$0xff]  ;;  %v277_v14 = vld [vmem:[%s1673_s6 + $0x88] sm:$0xff] }
  0x1a   :  { %978 = vmatprep.subr.bf16.mxu1 %v1131_v3  ;;  %v279_v15 = vld [vmem:[%s1673_s6 + $0x98] sm:$0xff]  ;;  %v1001_v16 = vpack.c.bf16 %v274_v13, %v272_v12  ;;  %v276_v18 = vld [vmem:[%s1673_s6 + $0x80] sm:$0xff]  ;;  %v278_v19 = vld [vmem:[%s1673_s6 + $0x90] sm:$0xff] }
  0x1b   :  { %v1003_v17 = vpack.c.bf16 %v279_v15, %v277_v14  ;;  %v281_v20 = vld [vmem:[%s1673_s6 + $0xa8] sm:$0xff]  ;;  %v283_v21 = vld [vmem:[%s1673_s6 + $0xb8] sm:$0xff]  ;;  %v1005_v22 = vpack.c.bf16 %v278_v19, %v276_v18  ;;  %v280_v24 = vld [vmem:[%s1673_s6 + $0xa0] sm:$0xff] }
  0x1c   :  { %959 = vmatpush3.bf16.msra.mxu0 %v958_v39  ;;  %v1007_v23 = vpack.c.bf16 %v283_v21, %v281_v20  ;;  %v282_v25 = vld [vmem:[%s1673_s6 + $0xb0] sm:$0xff]  ;;  %v285_v26 = vld [vmem:[%s1673_s6 + $0xc8] sm:$0xff]  ;;  %v287_v27 = vld [vmem:[%s1673_s6 + $0xd8] sm:$0xff] }
  0x1d   :  { %960 = vmatprep.subr.bf16.mxu0 %v1131_v3  ;;  %980 = vmatpush3.bf16.msra.mxu1 %v979_v42  ;;  %v1009_v28 = vpack.c.bf16 %v282_v25, %v280_v24  ;;  %v1011_v29 = vpack.c.bf16 %v287_v27, %v285_v26  ;;  %v284_v30 = vld [vmem:[%s1673_s6 + $0xc0] sm:$0xff]  ;;  %v286_v31 = vld [vmem:[%s1673_s6 + $0xd0] sm:$0xff]  ;;  %v406_v53 = vld [vmem:[%s1675_s8 + $0x8] sm:$0xff] }
  0x1e   :  { %981 = vmatprep.subr.bf16.mxu1 %v1131_v3  ;;  %v1013_v32 = vpack.c.bf16 %v286_v31, %v284_v30  ;;  %v695_v33 = vld [vmem:[%s1670_s3] ss:$0 sm:$0xff]  ;;  %v290_v50 = vld [vmem:[%s1673_s6 + $0xf0] sm:$0xff]  ;;  %v412_v13 = vld [vmem:[%s1675_s8 + $0x38] sm:$0xff] }
  0x1f   :  { %v407_v54 = vld [vmem:[%s1675_s8 + $0x10] sm:$0xff]  ;;  %v696_v58 = vld [vmem:[%s1672_s5] ss:$0 sm:$0xff]  ;;  %v416_v19 = vld [vmem:[%s1675_s8 + $0x58] sm:$0xff] }
  0x20   :  { %962 = vmatpush3.bf16.msra.mxu0 %v961_v45  ;;  %v409_v9 = vld [vmem:[%s1675_s8 + $0x20] sm:$0xff]  ;;  %v411_v12 = vld [vmem:[%s1675_s8 + $0x30] sm:$0xff]  ;;  %v420_v25 = vld [vmem:[%s1675_s8 + $0x78] sm:$0xff] }
  0x21   :  { %983 = vmatpush3.bf16.msra.mxu1 %v982_v46  ;;  %988 = vmatprep.subr.bf16.mxu0 %v987_v56  ;;  %v289_v46 = vld [vmem:[%s1673_s6 + $0xe8] sm:$0xff]  ;;  %v408_v56 = vld [vmem:[%s1675_s8 + $0x18] sm:$0xff]  ;;  %v1029_v14 = vpack.c.bf16 %v412_v13, %v411_v12  ;;  %v413_v15 = vld [vmem:[%s1675_s8 + $0x40] sm:$0xff] }
  0x22   :  { %984 = vmatprep.subr.bf16.mxu1 %v1131_v3  ;;  %v1023_v57 = vpack.c.bf16 %v408_v56, %v407_v54  ;;  %v415_v18 = vld [vmem:[%s1675_s8 + $0x50] sm:$0xff]  ;;  %v417_v21 = vld [vmem:[%s1675_s8 + $0x60] sm:$0xff]  ;;  %v514_v31 = vld [vmem:[%s1677_s10 + $0x18] sm:$0xff] }
  0x23   :  { %808 = vmatmul.mubr.f32.vlgmr.msra.gmra.mrb[0].mxu0 %v45_v47  ;;  %v291_v47 = vld [vmem:[%s1673_s6 + $0xf8] sm:$0xff]  ;;  %v1035_v20 = vpack.c.bf16 %v416_v19, %v415_v18  ;;  %v419_v24 = vld [vmem:[%s1675_s8 + $0x70] sm:$0xff]  ;;  %v511_v27 = vld [vmem:[%s1677_s10] sm:$0xff] }
  0x24   :  { %810 = vmatprep.mubr.msk.f32.mxu0 %vm1132_vm0, %v1133_v6  ;;  %990 = vmatpush1.bf16.msra.mxu0 %v989_v60  ;;  %v1041_v26 = vpack.c.bf16 %v420_v25, %v419_v24  ;;  %v389_v18 = vld [vmem:[%s1668_s1 + $0x10] sm:$0xff]  ;;  %v526_v24 = vld [vmem:[%s1677_s10 + $0x78] sm:$0xff] }
  0x25   :  { %986 = vmatpush3.bf16.msra.mxu1 %v985_v52  ;;  %992 = vmatprep.subr.bf16.mxu0 %v991_v61  ;;  %v405_v52 = vld [vmem:[%s1675_s8] sm:$0xff] }
  0x26   :  { %1019 = vmatprep.subr.bf16.mxu1 %v1131_v3  ;;  %v1020_v55 = vpack.c.bf16 %v406_v53, %v405_v52 }
  0x27   :  { %811 = vmatmul.mubr.f32.gmra.mrb[2].mxu0 %v46_v48  ;;  %v1015_v48 = vpack.c.bf16 %v291_v47, %v289_v46  ;;  %v524_v46 = vld [vmem:[%s1677_s10 + $0x68] sm:$0xff] }
  0x28   :  { %813 = vmatprep.mubr.msk.f32.mxu0 %vm1132_vm0, %v1133_v6  ;;  %994 = vmatpush1.bf16.msra.mxu0 %v993_v2 }
  0x29   :  { %996 = vmatprep.subr.bf16.mxu0 %v995_v4 }
  0x2b   :  { %814 = vmatmul.mubr.f32.gmra.mrb[4].mxu0 %v47_v49  ;;  %v288_v49 = vld [vmem:[%s1673_s6 + $0xe0] sm:$0xff] }
  0x2c   :  { %368 = vmatprep.mubr.f32.mxu0 %v1133_v6  ;;  %998 = vmatpush1.bf16.msra.mxu0 %v997_v10  ;;  %v1017_v51 = vpack.c.bf16 %v290_v50, %v288_v49  ;;  %v410_v10 = vld [vmem:[%s1675_s8 + $0x28] sm:$0xff] }
  0x2d   :  { %1000 = vmatprep.subr.bf16.mxu0 %v999_v11  ;;  %v1026_v11 = vpack.c.bf16 %v410_v10, %v409_v9 }
  0x30   :  { %1002 = vmatpush1.bf16.msra.mxu0 %v1001_v16  ;;  %v414_v16 = vld [vmem:[%s1675_s8 + $0x48] sm:$0xff] }
  0x31   :  { %1004 = vmatprep.subr.bf16.mxu0 %v1003_v17  ;;  %v1032_v17 = vpack.c.bf16 %v414_v16, %v413_v15 }
  0x34   :  { %1006 = vmatpush1.bf16.msra.mxu0 %v1005_v22  ;;  %v418_v22 = vld [vmem:[%s1675_s8 + $0x68] sm:$0xff] }
  0x35   :  { %1008 = vmatprep.subr.bf16.mxu0 %v1007_v23  ;;  %v1038_v23 = vpack.c.bf16 %v418_v22, %v417_v21 }
  0x38   :  { %1010 = vmatpush1.bf16.msra.mxu0 %v1009_v28  ;;  %v512_v28 = vld [vmem:[%s1677_s10 + $0x8] sm:$0xff] }
  0x39   :  { %1012 = vmatprep.subr.bf16.mxu0 %v1011_v29  ;;  %v513_v29 = vld [vmem:[%s1677_s10 + $0x10] sm:$0xff]  ;;  %v1521_v30 = vpack.c.bf16 %v512_v28, %v511_v27 }
  0x3c   :  { %1014 = vmatpush1.bf16.msra.mxu0 %v1013_v32  ;;  %v1527_v32 = vpack.c.bf16 %v514_v31, %v513_v29 }
  0x3d   :  { %1016 = vmatprep.subr.bf16.mxu0 %v1015_v48  ;;  %v294_v48 = vlaneseq }
  0x3f   :  { %v295_v49 = vshrl.u32 %v294_v48, 7 }
  0x40   :  { %1018 = vmatpush1.bf16.msra.mxu0 %v1017_v51  ;;  %v292_v51 = vld [vmem:[%s1674_s7] sm:$0x3] }
  0x41   :  { %1043 = vmatprep.subr.bf16.mxu0 %v1131_v3  ;;  %v296_v50 = vsub.s32 0, %v295_v49  ;;  %v300_v52 = vsub.s32 1, %v295_v49 }
  0x43   :  { %v297_v53 = vrot.slane %v292_v51, %v296_v50  ;;  %v301_v54 = vrot.slane %v292_v51, %v300_v52 }
  0xf6   :  { %v137_v34 = vpop.f32.mrb[0].mxu0 }
  0xf7   :  { %v138_v35 = vadd.f32 %v695_v33, %v137_v34  ;;  %v809_v36 = vpop.f32.mrb[1].mxu0  ;;  %v516_v34 = vld [vmem:[%s1677_s10 + $0x28] sm:$0xff] }
  0xf8   :  { %v517_v36 = vld [vmem:[%s1677_s10 + $0x30] sm:$0xff] }
  0xf9   :  { %v151_v37 = vmax.f32 %v138_v35, 0.0 }
  0xfa   :  { %v142_v38 = vpop.f32.mrb[2].mxu0 }
  0xfb   :  { %v143_v39 = vadd.f32 %v695_v33, %v142_v38  ;;  %v812_v40 = vpop.f32.mrb[3].mxu0  ;;  %849 = vmatmul.mubr.f32.vlgmr.msra.gmra.mrb[0].mxu1 %v151_v37  ;;  %v518_v37 = vld [vmem:[%s1677_s10 + $0x38] sm:$0xff] }
  0xfc   :  { %851 = vmatprep.mubr.msk.f32.mxu1 %vm1132_vm0, %v1133_v6  ;;  %1021 = vmatpush3.bf16.msra.mxu1 %v1020_v55  ;;  %v1547_v38 = vpack.c.bf16 %v518_v37, %v517_v36  ;;  %v520_v40 = vld [vmem:[%s1677_s10 + $0x48] sm:$0xff] }
  0xfd   :  { %v152_v41 = vmax.f32 %v143_v39, 0.0  ;;  %1022 = vmatprep.subr.bf16.mxu1 %v1131_v3  ;;  %v519_v39 = vld [vmem:[%s1677_s10 + $0x40] sm:$0xff] }
  0xfe   :  { %v147_v42 = vpop.f32.mrb[4].mxu0 }
  0xff   :  { %v148_v43 = vadd.f32 %v695_v33, %v147_v42  ;;  %v815_v44 = vpop.f32.mrb[5].mxu0  ;;  %852 = vmatmul.mubr.f32.gmra.mrb[2].mxu1 %v152_v41  ;;  %v515_v33 = vld [vmem:[%s1677_s10 + $0x20] sm:$0xff]  ;;  %v1557_v41 = vpack.c.bf16 %v520_v40, %v519_v39  ;;  %v521_v42 = vld [vmem:[%s1677_s10 + $0x50] sm:$0xff] }
 0x100   :  { %854 = vmatprep.mubr.msk.f32.mxu1 %vm1132_vm0, %v1133_v6  ;;  %1024 = vmatpush3.bf16.msra.mxu1 %v1023_v57  ;;  %v1537_v35 = vpack.c.bf16 %v516_v34, %v515_v33 }
 0x101   :  { %v153_v45 = vmax.f32 %v148_v43, 0.0  ;;  %1025 = vmatprep.subr.bf16.mxu1 %v1131_v3  ;;  %v522_v43 = vld [vmem:[%s1677_s10 + $0x58] sm:$0xff] }
 0x102   :  { %v1567_v44 = vpack.c.bf16 %v522_v43, %v521_v42 }
 0x103   :  { %855 = vmatmul.mubr.f32.gmra.mrb[4].mxu1 %v153_v45  ;;  %v523_v45 = vld [vmem:[%s1677_s10 + $0x60] sm:$0xff] }
 0x104   :  { %889 = vmatprep.mubr.msk.f32.mxu1 %vm1132_vm0, %v1133_v6  ;;  %1027 = vmatpush3.bf16.msra.mxu1 %v1026_v11  ;;  %v1577_v47 = vpack.c.bf16 %v524_v46, %v523_v45  ;;  %v387_v11 = vld [vmem:[%s1668_s1] sm:$0xff] }
 0x105   :  { %1028 = vmatprep.subr.bf16.mxu1 %v1131_v3 }
 0x108   :  { %1030 = vmatpush3.bf16.msra.mxu1 %v1029_v14  ;;  %v388_v14 = vld [vmem:[%s1668_s1 + $0x8] sm:$0xff] }
 0x109   :  { %1031 = vmatprep.subr.bf16.mxu1 %v1131_v3 }
 0x10c   :  { %1033 = vmatpush3.bf16.msra.mxu1 %v1032_v17 }
 0x10d   :  { %1034 = vmatprep.subr.bf16.mxu1 %v1131_v3 }
 0x110   :  { %1036 = vmatpush3.bf16.msra.mxu1 %v1035_v20 }
 0x111   :  { %1037 = vmatprep.subr.bf16.mxu1 %v1131_v3 }
 0x114   :  { %1039 = vmatpush3.bf16.msra.mxu1 %v1038_v23  ;;  %v525_v23 = vld [vmem:[%s1677_s10 + $0x70] sm:$0xff] }
 0x115   :  { %1040 = vmatprep.subr.bf16.mxu1 %v1131_v3  ;;  %v1065_v25 = vpack.c.bf16 %v526_v24, %v525_v23 }
 0x118   :  { %1042 = vmatpush3.bf16.msra.mxu1 %v1041_v26  ;;  %v697_v26 = vld [vmem:[%s1676_s9] ss:$0 sm:$0xff] }
 0x119   :  { %1067 = vmatprep.subr.bf16.mxu1 %v1131_v3 }
 0x1ce   :  { %v243_v59 = vpop.f32.mrb[0].mxu1 }
 0x1cf   :  { %v244_v60 = vadd.f32 %v696_v58, %v243_v59  ;;  %v850_v61 = vpop.f32.mrb[1].mxu1 }
 0x1d1   :  { %v257_v62 = vmax.f32 %v244_v60, 0.0 }
 0x1d2   :  { %v248_v63 = vpop.f32.mrb[2].mxu1 }
 0x1d3   :  { %v249_v0 = vadd.f32 %v696_v58, %v248_v63  ;;  %v853_v1 = vpop.f32.mrb[3].mxu1  ;;  %369 = vmatmul.mubr.f32.vlgmr.msra.gmra.mrb[6].mxu0 %v257_v62 }
 0x1d4   :  { %374 = vmatprep.mubr.f32.mxu0 %v1133_v6  ;;  %1045 = vmatpush3.bf16.msra.mxu0 %v1521_v30 }
 0x1d5   :  { %v258_v2 = vmax.f32 %v249_v0, 0.0  ;;  %1046 = vmatprep.subr.bf16.mxu0 %v1131_v3 }
 0x1d6   :  { %v253_v4 = vpop.f32.mrb[4].mxu1 }
 0x1d7   :  { %v254_v5 = vadd.f32 %v696_v58, %v253_v4  ;;  %v856_v7 = vpop.f32.mrb[5].mxu1  ;;  %375 = vmatmul.mubr.f32.gmra.mrb[8].mxu0 %v258_v2 }
 0x1d8   :  { %380 = vmatprep.mubr.f32.mxu0 %v1133_v6  ;;  %1048 = vmatpush3.bf16.msra.mxu0 %v1527_v32 }
 0x1d9   :  { %v259_v8 = vmax.f32 %v254_v5, 0.0  ;;  %1049 = vmatprep.subr.bf16.mxu0 %v1131_v3 }
 0x1db   :  { %381 = vmatmul.mubr.f32.gmra.mrb[10].mxu0 %v259_v8 }
 0x1dc   :  { %930 = vmatprep.mubr.msk.f32.mxu0 %vm1132_vm0, %v1133_v6  ;;  %1051 = vmatpush3.bf16.msra.mxu0 %v1537_v35 }
 0x1dd   :  { %1052 = vmatprep.subr.bf16.mxu0 %v1131_v3 }
 0x1e0   :  { %1054 = vmatpush3.bf16.msra.mxu0 %v1547_v38 }
 0x1e1   :  { %1055 = vmatprep.subr.bf16.mxu0 %v1131_v3 }
 0x1e4   :  { %1057 = vmatpush3.bf16.msra.mxu0 %v1557_v41 }
 0x1e5   :  { %1058 = vmatprep.subr.bf16.mxu0 %v1131_v3 }
 0x1e8   :  { %1060 = vmatpush3.bf16.msra.mxu0 %v1567_v44 }
 0x1e9   :  { %1061 = vmatprep.subr.bf16.mxu0 %v1131_v3 }
 0x1ec   :  { %1063 = vmatpush3.bf16.msra.mxu0 %v1577_v47 }
 0x1ed   :  { %1064 = vmatprep.subr.bf16.mxu0 %v1131_v3 }
 0x1f0   :  { %1066 = vmatpush3.bf16.msra.mxu0 %v1065_v25 }
 0x2a6   :  { %v370_v55 = vpop.f32.mrb[6].mxu0 }
 0x2a7   :  { %v371_v56 = vadd.f32 %v370_v55, %v297_v53  ;;  %v372_v57 = vpop.f32.mrb[7].mxu0 }
 0x2a8   :  { %v373_v58 = vadd.f32 %v372_v57, %v301_v54 }
 0x2a9   :  { %662 = vst [vmem:[%s1680_s13] sm:$0xff] %v371_v56 }
 0x2aa   :  { %v390_v59 = vmul.f32 0.5, %v373_v58  ;;  %663 = vst [vmem:[%s1680_s13 + $0x8] sm:$0xff] %v373_v58  ;;  %v376_v60 = vpop.f32.mrb[8].mxu0 }
 0x2ab   :  { %v377_v61 = vadd.f32 %v376_v60, %v297_v53  ;;  %v378_v62 = vpop.f32.mrb[9].mxu0 }
 0x2ac   :  { %v393_v63 = vmul.f32 1.442695, %v390_v59  ;;  %v379_v0 = vadd.f32 %v378_v62, %v301_v54 }
 0x2ad   :  { %664 = vst [vmem:[%s1680_s13 + $0x10] sm:$0xff] %v377_v61 }
 0x2ae   :  { %1089 = vpow2.f32 %v393_v63  ;;  %v391_v1 = vmul.f32 0.5, %v379_v0  ;;  %665 = vst [vmem:[%s1680_s13 + $0x18] sm:$0xff] %v379_v0  ;;  %v382_v2 = vpop.f32.mrb[10].mxu0 }
 0x2af   :  { %v383_v4 = vadd.f32 %v382_v2, %v297_v53  ;;  %v384_v5 = vpop.f32.mrb[11].mxu0 }
 0x2b0   :  { %v395_v7 = vmul.f32 1.442695, %v391_v1  ;;  %v385_v8 = vadd.f32 %v384_v5, %v301_v54 }
 0x2b1   :  { %666 = vst [vmem:[%s1680_s13 + $0x20] sm:$0xff] %v383_v4 }
 0x2b2   :  { %1091 = vpow2.f32 %v395_v7  ;;  %v392_v9 = vmul.f32 0.5, %v385_v8  ;;  %667 = vst [vmem:[%s1680_s13 + $0x28] sm:$0xff] %v385_v8 }
 0x2b4   :  { %v397_v10 = vmul.f32 1.442695, %v392_v9 }
 0x2b6   :  { %1093 = vpow2.f32 %v397_v10 }
 0x2b8   :  { %v1090_v12 = vpop.eup %1089 }
 0x2b9   :  { %v399_v13 = vmul.f32 %v1090_v12, %v387_v11 }
 0x2bb   :  { %v402_v15 = vadd.f32 %v399_v13, %v371_v56 }
 0x2bc   :  { %v1092_v16 = vpop.eup %1091 }
 0x2bd   :  { %890 = vmatmul.mubr.f32.vlgmr.msra.gmra.mrb[6].mxu1 %v402_v15  ;;  %668 = vst [vmem:[%s1681_s14] sm:$0xff] %v402_v15  ;;  %v400_v17 = vmul.f32 %v1092_v16, %v388_v14 }
 0x2be   :  { %892 = vmatprep.mubr.msk.f32.mxu1 %vm1132_vm0, %v1133_v6  ;;  %1075 = vmatpush3.bf16.msra.mxu1 %v1521_v30 }
 0x2bf   :  { %v403_v19 = vadd.f32 %v400_v17, %v377_v61  ;;  %1068 = vmatprep.subr.bf16.mxu1 %v1131_v3 }
 0x2c0   :  { %v1094_v20 = vpop.eup %1093 }
 0x2c1   :  { %893 = vmatmul.mubr.f32.gmra.mrb[8].mxu1 %v403_v19  ;;  %669 = vst [vmem:[%s1681_s14 + $0x8] sm:$0xff] %v403_v19  ;;  %v401_v21 = vmul.f32 %v1094_v20, %v389_v18 }
 0x2c2   :  { %895 = vmatprep.mubr.msk.f32.mxu1 %vm1132_vm0, %v1133_v6  ;;  %1076 = vmatpush3.bf16.msra.mxu1 %v1527_v32 }
 0x2c3   :  { %v404_v22 = vadd.f32 %v401_v21, %v383_v4  ;;  %1069 = vmatprep.subr.bf16.mxu1 %v1131_v3 }
 0x2c5   :  { %896 = vmatmul.mubr.f32.gmra.mrb[10].mxu1 %v404_v22  ;;  %670 = vst [vmem:[%s1681_s14 + $0x10] sm:$0xff] %v404_v22 }
 0x2c6   :  { %1077 = vmatpush3.bf16.msra.mxu1 %v1537_v35  ;;  %933 = vmatprep.mubr.msk.f32.mxu1 %vm1132_vm0, %v1133_v6 }
 0x2c7   :  { %1070 = vmatprep.subr.bf16.mxu1 %v1131_v3 }
 0x2ca   :  { %1078 = vmatpush3.bf16.msra.mxu1 %v1547_v38  ;;  %v698_v38 = vld [vmem:[%s1678_s11] ss:$0 sm:$0xff]  ;;  %s1134_s11 = smov [#allocation2]  }
 0x2cb   :  { %1071 = vmatprep.subr.bf16.mxu1 %v1131_v3  ;;  %s676_s24 = sshll.u32 %s1134_s11, 4  ;;  %s677_s24 = int_to_ptr.vmem [resolvable:$true] %s676_s24 }
 0x2cc   :  { %s1107_s7 = scalar_lea.vmem %s677_s24, 384  ;;  %p1112_p1 = scmp.lt.s32.totalorder %s677_s24, %s677_s24 }
 0x2cd   :  { %p1108_p0 = scmp.ne.s32.totalorder %s677_s24, %s1107_s7  ;;  %p1113_p2 = scmp.lt.s32.totalorder %s1107_s7, %s1107_s7 }
 0x2ce   :  { %1079 = vmatpush3.bf16.msra.mxu1 %v1557_v41 }
 0x2cf   :  { %1072 = vmatprep.subr.bf16.mxu1 %v1131_v3  ;;  %p1114_p3 = por %p1113_p2, %p1112_p1 }
 0x2d1   :  { %p1115_p4 = pnand %p1114_p3, %p1108_p0 }
 0x2d2   :  { %1080 = vmatpush3.bf16.msra.mxu1 %v1567_v44 }
 0x2d3   :  { %1073 = vmatprep.subr.bf16.mxu1 %v1131_v3 }
 0x2d6   :  { %1081 = vmatpush3.bf16.msra.mxu1 %v1577_v47 }
 0x2d7   :  { %1074 = vmatprep.subr.bf16.mxu1 %v1131_v3 }
 0x2da   :  { %1082 = vmatpush3.bf16.msra.mxu1 %v1065_v25 }
 0x390   :  { %v494_v27 = vpop.f32.mrb[6].mxu1 }
 0x391   :  { %v495_v28 = vadd.f32 %v697_v26, %v494_v27  ;;  %v891_v29 = vpop.f32.mrb[7].mxu1 }
 0x393   :  { %v508_v30 = vmax.f32 %v495_v28, 0.0 }
 0x394   :  { %v499_v3 = vpop.f32.mrb[8].mxu1 }
 0x395   :  { %v500_v31 = vadd.f32 %v697_v26, %v499_v3  ;;  %v894_v32 = vpop.f32.mrb[9].mxu1  ;;  %931 = vmatmul.mubr.f32.vlgmr.msra.gmra.mrb[12].mxu0 %v508_v30 }
 0x397   :  { %v509_v33 = vmax.f32 %v500_v31, 0.0 }
 0x398   :  { %v504_v34 = vpop.f32.mrb[10].mxu1 }
 0x399   :  { %v505_v35 = vadd.f32 %v697_v26, %v504_v34  ;;  %v897_v36 = vpop.f32.mrb[11].mxu1  ;;  %934 = vmatmul.mubr.f32.vlgmr.msra.gmra.mrb[12].mxu1 %v509_v33 }
 0x39a   :  { %936 = vmatprep.mubr.msk.f32.mxu1 %vm1132_vm0, %v1133_v6 }
 0x39b   :  { %v510_v37 = vmax.f32 %v505_v35, 0.0 }
 0x39d   :  { %937 = vmatmul.mubr.f32.gmra.mrb[14].mxu1 %v510_v37 }
 0x468   :  { %v600_v39 = vpop.f32.mrb[12].mxu0 }
 0x469   :  { %v601_v40 = vadd.f32 %v698_v38, %v600_v39  ;;  %v932_v41 = vpop.f32.mrb[13].mxu0 }
 0x46b   :  { %v617_v42 = vand.u32 2147483647, %v601_v40  ;;  %v614_v9 = vmax.f32 %v601_v40, 0.0 }
 0x46c   :  { %v605_v43 = vpop.f32.mrb[12].mxu1 }
 0x46d   :  { %v620_v44 = vsub.f32 0.0, %v617_v42  ;;  %v606_v45 = vadd.f32 %v698_v38, %v605_v43  ;;  %v935_v46 = vpop.f32.mrb[13].mxu1 }
 0x46f   :  { %v623_v47 = vmul.f32 1.442695, %v620_v44  ;;  %v618_v48 = vand.u32 2147483647, %v606_v45  ;;  %v615_v17 = vmax.f32 %v606_v45, 0.0 }
 0x470   :  { %v610_v49 = vpop.f32.mrb[14].mxu1 }
 0x471   :  { %1095 = vpow2.f32 %v623_v47  ;;  %v621_v50 = vsub.f32 0.0, %v618_v48  ;;  %v611_v6 = vadd.f32 %v698_v38, %v610_v49  ;;  %v938_v51 = vpop.f32.mrb[15].mxu1 }
 0x473   :  { %v625_v52 = vmul.f32 1.442695, %v621_v50  ;;  %v619_v53 = vand.u32 2147483647, %v611_v6  ;;  %v616_v24 = vmax.f32 %v611_v6, 0.0 }
 0x475   :  { %1097 = vpow2.f32 %v625_v52  ;;  %v622_v54 = vsub.f32 0.0, %v619_v53 }
 0x477   :  { %v627_v55 = vmul.f32 1.442695, %v622_v54 }
 0x479   :  { %1099 = vpow2.f32 %v627_v55 }
 0x47b   :  { %v1096_v56 = vpop.eup %1095 }
 0x47c   :  { %v629_v57 = vadd.f32 1.0, %v1096_v56  ;;  %v632_v60 = vmul.f32 -0.5, %v1096_v56  ;;  %v635_v1 = vand.u32 2147483647, %v1096_v56 }
 0x47e   :  { %1101 = vlog2.f32 %v629_v57  ;;  %v633_v63 = vadd.f32 1.0, %v632_v60  ;;  %vm636_vm1 = vcmp.lt.f32.partialorder %v635_v1, 0.0004427343 }
 0x47f   :  { %v1098_v58 = vpop.eup %1097 }
 0x480   :  { %v638_v59 = vadd.f32 1.0, %v1098_v58  ;;  %v641_v0 = vmul.f32 -0.5, %v1098_v58  ;;  %v634_v5 = vmul.f32 %v1096_v56, %v633_v63  ;;  %v644_v10 = vand.u32 2147483647, %v1098_v58 }
 0x482   :  { %1103 = vlog2.f32 %v638_v59  ;;  %v642_v7 = vadd.f32 1.0, %v641_v0  ;;  %vm645_vm2 = vcmp.lt.f32.partialorder %v644_v10, 0.0004427343 }
 0x483   :  { %v1100_v61 = vpop.eup %1099 }
 0x484   :  { %v647_v62 = vadd.f32 1.0, %v1100_v61  ;;  %v650_v8 = vmul.f32 -0.5, %v1100_v61  ;;  %v643_v15 = vmul.f32 %v1098_v58, %v642_v7  ;;  %v653_v18 = vand.u32 2147483647, %v1100_v61 }
 0x486   :  { %1105 = vlog2.f32 %v647_v62  ;;  %v651_v16 = vadd.f32 1.0, %v650_v8  ;;  %vm654_vm3 = vcmp.lt.f32.partialorder %v653_v18, 0.0004427343 }
 0x488   :  { %v1102_v2 = vpop.eup %1101  ;;  %v652_v23 = vmul.f32 %v1100_v61, %v651_v16 }
 0x489   :  { %v631_v4 = vmul.f32 0.6931472, %v1102_v2 }
 0x48b   :  { %v637_v11 = vsel %vm636_vm1, %v634_v5, %v631_v4 }
 0x48c   :  { %v1104_v12 = vpop.eup %1103  ;;  %v656_v13 = vadd.f32 %v637_v11, %v614_v9 }
 0x48d   :  { %v640_v14 = vmul.f32 0.6931472, %v1104_v12 }
 0x48e   :  { %659 = vst [vmem:[#allocation2] sm:$0xff] %v656_v13 }
 0x48f   :  { %v646_v19 = vsel %vm645_vm2, %v643_v15, %v640_v14 }
 0x490   :  { %v1106_v20 = vpop.eup %1105  ;;  %v657_v21 = vadd.f32 %v646_v19, %v615_v17 }
 0x491   :  { %v649_v22 = vmul.f32 0.6931472, %v1106_v20 }
 0x492   :  { %660 = vst [vmem:[#allocation2 + $0x8] sm:$0xff] %v657_v21 }
 0x493   :  { %v655_v25 = vsel %vm654_vm3, %v652_v23, %v649_v22 }
 0x494   :  { %v658_v26 = vadd.f32 %v655_v25, %v616_v24 }
 0x496   :  { %661 = vst [vmem:[#allocation2 + $0x10] sm:$0xff] %v658_v26 }
 0x497   :  { %1118 = shalt.err (!%p1115_p4)
}
 0x498   :  { %s1119_s25 = scalar_lea.hbm %s1679_s12, 384 }
 0x499   :  { %p1120_p5 = scmp.ne.s32.totalorder %s1679_s12, %s1119_s25  ;;  %p1123_p6 = scmp.lt.u32.totalorder %s1119_s25, %s1679_s12 }
 0x49b   :  { %p1125_p7 = pnand %p1123_p6, %p1120_p5 }
 0x49d   :  { %1128 = shalt.err (!%p1125_p7)
}
 0x49e   :  { %s1135_s6 = smov 128   ;;  %s1136_s30 = smov 8  }
 0x49f   :  { %682 = dma.vmem_to_hbm [thread:$0]  %s677_s24, 384, %s1679_s12, [#allocation3], %s1135_s6, %s1135_s6, %s1136_s30  }
 0x4a0   :  { %1129 = dma.done.wait [#allocation3], 384  }
 0x4a1   :  { %1130 = vsyncadd [#allocation3], 4294966912 }
 0x4a2   :  { %694 = vsyncpa [#allocation3], 1 }

</bundles_post_ra>
